<compile_context>
chip_gen: v7x
topology: tpu7x:2x2x1
jax: 0.10.0
libtpu: 0.0.40
codegen_flags: <defaults>
</compile_context>

<pallas_src>
import math

import jax
import jax.numpy as jnp
import numpy as np
from jax import lax
from jax.experimental import pallas as pl
from jax.experimental.pallas import tpu as pltpu

_BN_EPS = 1e-3   # FCLayers uses BatchNorm1d(..., eps=0.001)
_LANE = 128      # vreg lane width


def _round_up(n, m):
    return ((n + m - 1) // m) * m


def _pad_to(a, shape):
    pads = [(0, s - d) for d, s in zip(a.shape, shape)]
    return jnp.pad(a, pads)


# --------------------------------- kernel ---------------------------------

def _make_decoder_kernel(n_hidden_layers, n_out_pad):
    """Returns a kernel: x, [W,b,gamma,beta] * L, Wmv, bmv  ->  packed (B, 2*n_out_pad)."""

    def kernel(*refs):
        x_ref = refs[0]
        layer_refs = refs[1:1 + 4 * n_hidden_layers]
        wmv_ref = refs[1 + 4 * n_hidden_layers]
        bmv_ref = refs[2 + 4 * n_hidden_layers]
        out_ref = refs[3 + 4 * n_hidden_layers]

        h = x_ref[...]
        for l in range(n_hidden_layers):
            w_ref, b_ref, g_ref, be_ref = layer_refs[4 * l:4 * l + 4]
            y = jnp.dot(h, w_ref[...], preferred_element_type=jnp.float32) + b_ref[...]
            # train-mode BN: batch stats over axis 0, biased variance (one-pass form)
            mu = jnp.mean(y, axis=0, keepdims=True)
            var = jnp.mean(y * y, axis=0, keepdims=True) - mu * mu
            scale = g_ref[...] * lax.rsqrt(var + _BN_EPS)
            shift = be_ref[...] - mu * scale
            h = jnp.maximum(y * scale + shift, 0.0)          # folded BN + ReLU

        # fused mean/var head: one MXU matmul, lane-dense packed output store
        raw = jnp.dot(h, wmv_ref[...], preferred_element_type=jnp.float32) + bmv_ref[...]
        out_ref[...] = jnp.concatenate(
            [raw[:, :n_out_pad], jnp.exp(raw[:, n_out_pad:])], axis=-1
        )

    return kernel


# --------------------------------- wrapper ---------------------------------

def decoder_forward(x, layer_params, mean_params, var_params):
    """Fused scvi Decoder forward.

    x: (B, n_input) f32.
    layer_params: list of (W (in,out), b (1,out), gamma (1,out), beta (1,out)) per FC layer.
    mean_params / var_params: (W (n_hidden, n_out), b (1, n_out)).
    Returns (p_m, p_v), each (B, n_out) f32.
    """
    B, n_in = x.shape
    n_hidden = layer_params[-1][0].shape[1]
    n_out = mean_params[0].shape[1]

    din_p = _round_up(n_in, _LANE)
    h_p = _round_up(n_hidden, _LANE)
    nop = _round_up(n_out, _LANE)

    # Zero-pad features to the 128-lane width (zero rows/cols contribute nothing).
    operands = [_pad_to(x, (B, din_p))]
    in_dim_p = din_p
    for (w, b, g, be) in layer_params:
        operands += [
            _pad_to(w, (in_dim_p, h_p)),
            _pad_to(b, (1, h_p)),
            _pad_to(g, (1, h_p)),
            _pad_to(be, (1, h_p)),
        ]
        in_dim_p = h_p

    # Fuse mean/var projection weights into one (h_p, 2*nop) matrix, var half at lane
    # offset `nop` so the in-kernel split lands on a 128-aligned boundary.
    wm, bm = mean_params
    wv, bv = var_params
    wmv = jnp.zeros((h_p, 2 * nop), jnp.float32)
    wmv = wmv.at[:n_hidden, :n_out].set(wm)
    wmv = wmv.at[:n_hidden, nop:nop + n_out].set(wv)
    bmv = jnp.zeros((1, 2 * nop), jnp.float32)
    bmv = bmv.at[:, :n_out].set(bm)
    bmv = bmv.at[:, nop:nop + n_out].set(bv)
    operands += [wmv, bmv]

    vmem_spec = pl.BlockSpec(memory_space=pltpu.MemorySpace.VMEM)
    out = pl.pallas_call(
        _make_decoder_kernel(len(layer_params), nop),
        out_shape=jax.ShapeDtypeStruct((B, 2 * nop), jnp.float32),
        in_specs=[vmem_spec] * len(operands),
        out_specs=vmem_spec,
    )(*operands)

    p_m = out[:, :n_out]
    p_v = out[:, nop:nop + n_out]
    return p_m, p_v


# --------------------------- reference (pure JAX) ---------------------------

def _reference_forward(x, layer_params, mean_params, var_params):
    h = x
    for (w, b, g, be) in layer_params:
        y = h @ w + b
        mu = jnp.mean(y, axis=0, keepdims=True)
        var = jnp.mean((y - mu) ** 2, axis=0, keepdims=True)
        h = jnp.maximum((y - mu) / jnp.sqrt(var + _BN_EPS) * g + be, 0.0)
    wm, bm = mean_params
    wv, bv = var_params
    return h @ wm + bm, jnp.exp(h @ wv + bv)


# ---------------- deterministic parameter construction (PyTorch-default init) ----------------

def _init_linear(key, n_in, n_out):
    kw, kb = jax.random.split(key)
    bound = 1.0 / math.sqrt(n_in)
    w = jax.random.uniform(kw, (n_in, n_out), jnp.float32, -bound, bound)  # stored (in, out)
    b = jax.random.uniform(kb, (1, n_out), jnp.float32, -bound, bound)
    return w, b


def _init_linear_bn(key, n_in, n_out):
    w, b = _init_linear(key, n_in, n_out)
    gamma = jnp.ones((1, n_out), jnp.float32)
    beta = jnp.zeros((1, n_out), jnp.float32)
    return w, b, gamma, beta


if __name__ == "__main__":
    # Decoder configuration (small, consistent with Decoder.__init__ defaults: n_layers=1)
    n_input = 16       # latent dim
    n_output = 24      # data dim
    n_hidden = 32
    n_layers = 1
    batch = 8

    key = jax.random.PRNGKey(0)
    keys = jax.random.split(key, 8)

    # FCLayers: n_layers fully-connected hidden layers (n_input -> n_hidden -> ... -> n_hidden)
    dims = [n_input] + (n_layers - 1) * [n_hidden] + [n_hidden]
    layer_params = [
        _init_linear_bn(keys[i], dims[i], dims[i + 1]) for i in range(n_layers)
    ]
    mean_params = _init_linear(keys[4], n_hidden, n_output)
    var_params = _init_linear(keys[5], n_hidden, n_output)

    x = jax.random.normal(keys[6], (batch, n_input), jnp.float32)

    p_m, p_v = decoder_forward(x, layer_params, mean_params, var_params)
    jax.block_until_ready((p_m, p_v))

    # correctness vs pure-JAX reference
    ref_m, ref_v = _reference_forward(x, layer_params, mean_params, var_params)
    np.testing.assert_allclose(np.asarray(p_m), np.asarray(ref_m), rtol=1e-3, atol=1e-3)
    np.testing.assert_allclose(np.asarray(p_v), np.asarray(ref_v), rtol=1e-3, atol=1e-3)

    assert p_m.shape == (batch, n_output)
    assert p_v.shape == (batch, n_output)
    assert bool(jnp.all(jnp.isfinite(p_m))) and bool(jnp.all(p_v > 0))
    print("KERNEL_OK")
</pallas_src>

<mosaic_0001>
module attributes {stable_mosaic.version = 11 : i64} {
  func.func @kernel(%arg0: memref<8x128xf32, #tpu.memory_space<vmem>>, %arg1: memref<128x128xf32, #tpu.memory_space<vmem>>, %arg2: memref<1x128xf32, #tpu.memory_space<vmem>>, %arg3: memref<1x128xf32, #tpu.memory_space<vmem>>, %arg4: memref<1x128xf32, #tpu.memory_space<vmem>>, %arg5: memref<128x256xf32, #tpu.memory_space<vmem>>, %arg6: memref<1x256xf32, #tpu.memory_space<vmem>>, %arg7: memref<8x256xf32, #tpu.memory_space<vmem>>) attributes {dimension_semantics = [], scalar_prefetch = 0 : i64, scratch_operands = 0 : i64, tpu.core_type = #tpu.core_type<tc>} {
    %c0 = arith.constant 0 : index
    %c0_0 = arith.constant 0 : index
    %0 = vector.load %arg0[%c0, %c0_0] : memref<8x128xf32, #tpu.memory_space<vmem>>, vector<8x128xf32>
    %c0_1 = arith.constant 0 : index
    %c0_2 = arith.constant 0 : index
    %1 = vector.load %arg1[%c0_1, %c0_2] : memref<128x128xf32, #tpu.memory_space<vmem>>, vector<128x128xf32>
    %cst = arith.constant dense<0.000000e+00> : vector<8x128xf32>
    %2 = tpu.matmul %0, %1, %cst {dimension_numbers = #tpu.dot_dimension_numbers<[1], [0], [0], [1], [0, 0, 1, 1], [], []>} : vector<8x128xf32>, vector<128x128xf32>, vector<8x128xf32> -> vector<8x128xf32>
    %c0_3 = arith.constant 0 : index
    %c0_4 = arith.constant 0 : index
    %3 = vector.load %arg2[%c0_3, %c0_4] : memref<1x128xf32, #tpu.memory_space<vmem>>, vector<1x128xf32>
    %4 = vector.broadcast %3 : vector<1x128xf32> to vector<8x128xf32>
    %5 = arith.addf %2, %4 : vector<8x128xf32>
    %cst_5 = arith.constant dense<0.000000e+00> : vector<128xf32>
    %6 = vector.multi_reduction <add>, %5, %cst_5 [0] : vector<8x128xf32> to vector<128xf32>
    %7 = vector.shape_cast %6 : vector<128xf32> to vector<1x128xf32>
    %cst_6 = arith.constant 8.000000e+00 : f32
    %8 = vector.broadcast %cst_6 : f32 to vector<1x128xf32>
    %9 = arith.divf %7, %8 : vector<1x128xf32>
    %10 = arith.mulf %5, %5 : vector<8x128xf32>
    %cst_7 = arith.constant dense<0.000000e+00> : vector<128xf32>
    %11 = vector.multi_reduction <add>, %10, %cst_7 [0] : vector<8x128xf32> to vector<128xf32>
    %12 = vector.shape_cast %11 : vector<128xf32> to vector<1x128xf32>
    %cst_8 = arith.constant 8.000000e+00 : f32
    %13 = vector.broadcast %cst_8 : f32 to vector<1x128xf32>
    %14 = arith.divf %12, %13 : vector<1x128xf32>
    %15 = arith.mulf %9, %9 : vector<1x128xf32>
    %16 = arith.subf %14, %15 : vector<1x128xf32>
    %c0_9 = arith.constant 0 : index
    %c0_10 = arith.constant 0 : index
    %17 = vector.load %arg3[%c0_9, %c0_10] : memref<1x128xf32, #tpu.memory_space<vmem>>, vector<1x128xf32>
    %cst_11 = arith.constant 1.000000e-03 : f32
    %18 = vector.broadcast %cst_11 : f32 to vector<1x128xf32>
    %19 = arith.addf %16, %18 : vector<1x128xf32>
    %20 = math.rsqrt %19 : vector<1x128xf32>
    %21 = arith.mulf %17, %20 : vector<1x128xf32>
    %c0_12 = arith.constant 0 : index
    %c0_13 = arith.constant 0 : index
    %22 = vector.load %arg4[%c0_12, %c0_13] : memref<1x128xf32, #tpu.memory_space<vmem>>, vector<1x128xf32>
    %23 = arith.mulf %9, %21 : vector<1x128xf32>
    %24 = arith.subf %22, %23 : vector<1x128xf32>
    %25 = vector.broadcast %21 : vector<1x128xf32> to vector<8x128xf32>
    %26 = arith.mulf %5, %25 : vector<8x128xf32>
    %27 = vector.broadcast %24 : vector<1x128xf32> to vector<8x128xf32>
    %28 = arith.addf %26, %27 : vector<8x128xf32>
    %cst_14 = arith.constant 0.000000e+00 : f32
    %29 = vector.broadcast %cst_14 : f32 to vector<8x128xf32>
    %30 = arith.maximumf %28, %29 : vector<8x128xf32>
    %c0_15 = arith.constant 0 : index
    %c0_16 = arith.constant 0 : index
    %31 = vector.load %arg5[%c0_15, %c0_16] : memref<128x256xf32, #tpu.memory_space<vmem>>, vector<128x256xf32>
    %cst_17 = arith.constant dense<0.000000e+00> : vector<8x256xf32>
    %32 = tpu.matmul %30, %31, %cst_17 {dimension_numbers = #tpu.dot_dimension_numbers<[1], [0], [0], [1], [0, 0, 1, 1], [], []>} : vector<8x128xf32>, vector<128x256xf32>, vector<8x256xf32> -> vector<8x256xf32>
    %c0_18 = arith.constant 0 : index
    %c0_19 = arith.constant 0 : index
    %33 = vector.load %arg6[%c0_18, %c0_19] : memref<1x256xf32, #tpu.memory_space<vmem>>, vector<1x256xf32>
    %34 = vector.broadcast %33 : vector<1x256xf32> to vector<8x256xf32>
    %35 = arith.addf %32, %34 : vector<8x256xf32>
    %36 = vector.extract_strided_slice %35 {offsets = [0, 0], sizes = [8, 128], strides = [1, 1]} : vector<8x256xf32> to vector<8x128xf32>
    %37 = vector.extract_strided_slice %35 {offsets = [0, 128], sizes = [8, 128], strides = [1, 1]} : vector<8x256xf32> to vector<8x128xf32>
    %38 = math.exp %37 : vector<8x128xf32>
    %39 = tpu.concatenate %36, %38 in 1 : vector<8x128xf32>, vector<8x128xf32> -> vector<8x256xf32>
    %c0_20 = arith.constant 0 : index
    %c0_21 = arith.constant 0 : index
    %40 = vector.load %arg7[%c0_20, %c0_21] : memref<8x256xf32, #tpu.memory_space<vmem>>, vector<8x256xf32>
    tpu.vector_store %arg7[%c0_20, %c0_21], %39 {strides = array<i32>} : memref<8x256xf32, #tpu.memory_space<vmem>>, vector<8x256xf32>,
    return
  }
}

</mosaic_0001>

<bundles_post_ra>
// kernel: tpu_custom_call.1
= control target key start
LH: loop header
LB: loop body
LE: loop exit
PB: predicated region body
PF: predicated region fallthrough
CT: control target
= control target key end

     0   :  { %12 = vsyncpa [#allocation3], 0  ;;  %s664_s0 = inlined_call_operand.hbm [shape: f32[8,128], index: 0, kind: input, shape index: {}]   ;;  %s665_s1 = inlined_call_operand.hbm [shape: f32[128,128], index: 1, kind: input, shape index: {}]   ;;  %s666_s2 = inlined_call_operand.vmem [shape: f32[1,128], index: 2, kind: input, shape index: {}]   ;;  %s667_s3 = inlined_call_operand.vmem [shape: f32[1,128], index: 3, kind: input, shape index: {}]   ;;  %s668_s4 = inlined_call_operand.vmem [shape: f32[1,128], index: 4, kind: input, shape index: {}]   ;;  %s669_s5 = inlined_call_operand.hbm [shape: f32[128,256], index: 5, kind: input, shape index: {}]   ;;  %s670_s6 = inlined_call_operand.vmem [shape: f32[1,256], index: 6, kind: input, shape index: {}]   ;;  %s671_s7 = inlined_call_operand.hbm [shape: f32[8,256], index: 7, kind: output, shape index: {}]  }
   0x1   :  { %13 = vsyncpa [#allocation6], 0 }
   0x2   :  { %14 = vsyncpa [#allocation4], 0  ;;  %s553_s24 = smov [#allocation5]   ;;  %s459_s28 = scalar_lea.hbm %s665_s1, 2048 }
   0x3   :  { %s30_s25 = sshll.u32 %s553_s24, 4  ;;  %p460_p0 = scmp.ne.s32.totalorder %s665_s1, %s459_s28  ;;  %s31_s25 = int_to_ptr.vmem [resolvable:$true] %s30_s25 }
   0x4   :  { %p463_p1 = scmp.lt.u32.totalorder %s459_s28, %s665_s1 }
   0x6   :  { %p465_p2 = pnand %p463_p1, %p460_p0 }
   0x8   :  { %468 = shalt.err (!%p465_p2)
}
   0x9   :  { %s469_s10 = scalar_lea.vmem %s31_s25, 2048  ;;  %p474_p4 = scmp.lt.s32.totalorder %s31_s25, %s31_s25 }
   0xa   :  { %p470_p3 = scmp.ne.s32.totalorder %s31_s25, %s469_s10  ;;  %p475_p5 = scmp.lt.s32.totalorder %s469_s10, %s469_s10 }
   0xc   :  { %p476_p6 = por %p475_p5, %p474_p4 }
   0xe   :  { %p477_p7 = pnand %p476_p6, %p470_p3 }
  0x10   :  { %480 = shalt.err (!%p477_p7)
}
  0x11   :  { %s554_s11 = smov 128   ;;  %s555_s12 = smov 8  }
  0x12   :  { %36 = dma.hbm_to_vmem [thread:$0]  %s665_s1, 2048, %s31_s25, [#allocation6], %s554_s11, %s554_s11, %s555_s12  }
  0x13   :  { %s556_s15 = smov [#allocation2]   ;;  %s557_s17 = smov [#allocation7]  }
  0x14   :  { %s21_s16 = sshll.u32 %s556_s15, 4  ;;  %s48_s18 = sshll.u32 %s557_s17, 4  ;;  %s22_s16 = int_to_ptr.vmem [resolvable:$true] %s21_s16  ;;  %s49_s18 = int_to_ptr.vmem [resolvable:$true] %s48_s18 }
  0x15   :  { %s481_s21 = scalar_lea.hbm %s664_s0, 128 }
  0x16   :  { %p482_p8 = scmp.ne.s32.totalorder %s664_s0, %s481_s21  ;;  %p485_p9 = scmp.lt.u32.totalorder %s481_s21, %s664_s0 }
  0x18   :  { %p487_p10 = pnand %p485_p9, %p482_p8 }
  0x1a   :  { %490 = shalt.err (!%p487_p10)
}
  0x1b   :  { %s491_s1 = scalar_lea.vmem %s22_s16, 128  ;;  %p496_p12 = scmp.lt.s32.totalorder %s22_s16, %s22_s16 }
  0x1c   :  { %p492_p11 = scmp.ne.s32.totalorder %s22_s16, %s491_s1  ;;  %p497_p13 = scmp.lt.s32.totalorder %s491_s1, %s491_s1 }
  0x1e   :  { %p498_p0 = por %p497_p13, %p496_p12 }
  0x20   :  { %p499_p1 = pnand %p498_p0, %p492_p11 }
  0x22   :  { %502 = shalt.err (!%p499_p1)
}
  0x23   :  { %24 = dma.hbm_to_vmem [thread:$0]  %s664_s0, 128, %s22_s16, [#allocation3]  }
  0x24   :  { %s503_s30 = scalar_lea.hbm %s669_s5, 4096 }
  0x25   :  { %p504_p2 = scmp.ne.s32.totalorder %s669_s5, %s503_s30  ;;  %p507_p3 = scmp.lt.u32.totalorder %s503_s30, %s669_s5 }
  0x27   :  { %p509_p4 = pnand %p507_p3, %p504_p2 }
  0x29   :  { %512 = shalt.err (!%p509_p4)
}
  0x2a   :  { %s513_s12 = scalar_lea.vmem %s49_s18, 4096  ;;  %p518_p6 = scmp.lt.s32.totalorder %s49_s18, %s49_s18 }
  0x2b   :  { %p514_p5 = scmp.ne.s32.totalorder %s49_s18, %s513_s12  ;;  %p519_p7 = scmp.lt.s32.totalorder %s513_s12, %s513_s12 }
  0x2d   :  { %p520_p8 = por %p519_p7, %p518_p6 }
  0x2f   :  { %p521_p9 = pnand %p520_p8, %p514_p5 }
  0x31   :  { %524 = shalt.err (!%p521_p9)
}
  0x32   :  { %s558_s0 = smov 256   ;;  %s559_s13 = smov 16  }
  0x33   :  { %54 = dma.hbm_to_vmem [thread:$0]  %s669_s5, 4096, %s49_s18, [#allocation6], %s558_s0, %s558_s0, %s559_s13  }
  0x34   :  { %547 = dma.done.wait [#allocation3], 128  }
  0x35   :  { %548 = vsyncadd [#allocation3], 4294967168 }
  0x36   :  { %549 = dma.done.wait [#allocation6], 6144  }
  0x37   :  { %550 = vsyncadd [#allocation6], 4294961152  ;;  %v560_v0 = vmov 0.0|0.0   ;;  %vm561_vm0 = vmmov 0   ;;  %v562_v1 = vmov 0.0   ;;  %v67_v2 = vld [vmem:[#allocation5] sm:$0xff] }
  0x38   :  { %388 = vmatprep.subr.bf16.mxu0 %v560_v0  ;;  %385 = vmatprep.mubr.msk.f32.mxu0 %vm561_vm0, %v562_v1  ;;  %v68_v3 = vld [vmem:[#allocation5 + $0x8] sm:$0xff]  ;;  %v69_v4 = vld [vmem:[#allocation5 + $0x10] sm:$0xff]  ;;  %v70_v6 = vld [vmem:[#allocation5 + $0x18] sm:$0xff] }
  0x39   :  { %308 = vmatprep.mubr.f32.mxu1 %v562_v1  ;;  %v389_v5 = vpack.c.bf16 %v68_v3, %v67_v2  ;;  %v392_v7 = vpack.c.bf16 %v70_v6, %v69_v4  ;;  %v71_v8 = vld [vmem:[#allocation5 + $0x20] sm:$0xff]  ;;  %v72_v9 = vld [vmem:[#allocation5 + $0x28] sm:$0xff]  ;;  %v73_v11 = vld [vmem:[#allocation5 + $0x30] sm:$0xff] }
  0x3a   :  { %v395_v10 = vpack.c.bf16 %v72_v9, %v71_v8  ;;  %v74_v12 = vld [vmem:[#allocation5 + $0x38] sm:$0xff]  ;;  %v75_v14 = vld [vmem:[#allocation5 + $0x40] sm:$0xff]  ;;  %v76_v15 = vld [vmem:[#allocation5 + $0x48] sm:$0xff] }
  0x3b   :  { %390 = vmatpush3.bf16.msra.mxu0 %v389_v5  ;;  %v398_v13 = vpack.c.bf16 %v74_v12, %v73_v11  ;;  %v401_v16 = vpack.c.bf16 %v76_v15, %v75_v14  ;;  %v77_v17 = vld [vmem:[#allocation5 + $0x50] sm:$0xff]  ;;  %v78_v18 = vld [vmem:[#allocation5 + $0x58] sm:$0xff]  ;;  %v79_v20 = vld [vmem:[#allocation5 + $0x60] sm:$0xff] }
  0x3c   :  { %391 = vmatprep.subr.bf16.mxu0 %v560_v0  ;;  %v404_v19 = vpack.c.bf16 %v78_v18, %v77_v17  ;;  %v80_v21 = vld [vmem:[#allocation5 + $0x68] sm:$0xff]  ;;  %v81_v23 = vld [vmem:[#allocation5 + $0x70] sm:$0xff]  ;;  %v82_v24 = vld [vmem:[#allocation5 + $0x78] sm:$0xff] }
  0x3d   :  { %v407_v22 = vpack.c.bf16 %v80_v21, %v79_v20  ;;  %v410_v25 = vpack.c.bf16 %v82_v24, %v81_v23  ;;  %v66_v26 = vld [vmem:[#allocation2] sm:$0xff]  ;;  %v201_v27 = vld [vmem:[#allocation7 + $0x8] sm:$0xff]  ;;  %v200_v30 = vld [vmem:[#allocation7] sm:$0xff] }
  0x3e   :  { %v203_v28 = vld [vmem:[#allocation7 + $0x18] sm:$0xff]  ;;  %v202_v31 = vld [vmem:[#allocation7 + $0x10] sm:$0xff]  ;;  %v205_v33 = vld [vmem:[#allocation7 + $0x28] sm:$0xff] }
  0x3f   :  { %393 = vmatpush3.bf16.msra.mxu0 %v392_v7  ;;  %v412_v29 = vpack.c.bf16 %v203_v28, %v201_v27  ;;  %v414_v32 = vpack.c.bf16 %v202_v31, %v200_v30  ;;  %v207_v34 = vld [vmem:[#allocation7 + $0x38] sm:$0xff]  ;;  %v204_v36 = vld [vmem:[#allocation7 + $0x20] sm:$0xff]  ;;  %v206_v37 = vld [vmem:[#allocation7 + $0x30] sm:$0xff] }
  0x40   :  { %394 = vmatprep.subr.bf16.mxu0 %v560_v0  ;;  %v416_v35 = vpack.c.bf16 %v207_v34, %v205_v33  ;;  %v418_v38 = vpack.c.bf16 %v206_v37, %v204_v36  ;;  %v209_v39 = vld [vmem:[#allocation7 + $0x48] sm:$0xff]  ;;  %v211_v40 = vld [vmem:[#allocation7 + $0x58] sm:$0xff]  ;;  %v208_v41 = vld [vmem:[#allocation7 + $0x40] sm:$0xff]  ;;  %v186_v33 = vlaneseq }
  0x41   :  { %413 = vmatprep.subr.bf16.mxu1 %v412_v29  ;;  %v420_v42 = vpack.c.bf16 %v211_v40, %v209_v39  ;;  %v210_v43 = vld [vmem:[#allocation7 + $0x50] sm:$0xff]  ;;  %v213_v44 = vld [vmem:[#allocation7 + $0x68] sm:$0xff]  ;;  %v215_v45 = vld [vmem:[#allocation7 + $0x78] sm:$0xff] }
  0x42   :  { %415 = vmatpush1.bf16.msra.mxu1 %v414_v32  ;;  %v422_v46 = vpack.c.bf16 %v210_v43, %v208_v41  ;;  %v424_v47 = vpack.c.bf16 %v215_v45, %v213_v44  ;;  %v212_v48 = vld [vmem:[#allocation7 + $0x60] sm:$0xff]  ;;  %v214_v49 = vld [vmem:[#allocation7 + $0x70] sm:$0xff]  ;;  %v217_v50 = vld [vmem:[#allocation7 + $0x88] sm:$0xff]  ;;  %v187_v34 = vshrl.u32 %v186_v33, 7 }
  0x43   :  { %396 = vmatpush3.bf16.msra.mxu0 %v395_v10  ;;  %417 = vmatprep.subr.bf16.mxu1 %v416_v35  ;;  %v219_v51 = vld [vmem:[#allocation7 + $0x98] sm:$0xff]  ;;  %v426_v52 = vpack.c.bf16 %v214_v49, %v212_v48  ;;  %v216_v54 = vld [vmem:[#allocation7 + $0x80] sm:$0xff]  ;;  %v218_v55 = vld [vmem:[#allocation7 + $0x90] sm:$0xff] }
  0x44   :  { %397 = vmatprep.subr.bf16.mxu0 %v560_v0  ;;  %v428_v53 = vpack.c.bf16 %v219_v51, %v217_v50  ;;  %v221_v56 = vld [vmem:[#allocation7 + $0xa8] sm:$0xff]  ;;  %v223_v57 = vld [vmem:[#allocation7 + $0xb8] sm:$0xff]  ;;  %v430_v58 = vpack.c.bf16 %v218_v55, %v216_v54  ;;  %v220_v60 = vld [vmem:[#allocation7 + $0xa0] sm:$0xff]  ;;  %v188_v36 = vsub.s32 0, %v187_v34  ;;  %v240_v48 = vsub.s32 1, %v187_v34 }
  0x45   :  { %v432_v59 = vpack.c.bf16 %v223_v57, %v221_v56  ;;  %v222_v61 = vld [vmem:[#allocation7 + $0xb0] sm:$0xff]  ;;  %v225_v62 = vld [vmem:[#allocation7 + $0xc8] sm:$0xff]  ;;  %v227_v63 = vld [vmem:[#allocation7 + $0xd8] sm:$0xff] }
  0x46   :  { %419 = vmatpush1.bf16.msra.mxu1 %v418_v38  ;;  %v436_v1 = vpack.c.bf16 %v227_v63, %v225_v62  ;;  %v224_v2 = vld [vmem:[#allocation7 + $0xc0] sm:$0xff]  ;;  %v226_v3 = vld [vmem:[#allocation7 + $0xd0] sm:$0xff]  ;;  %v229_v4 = vld [vmem:[#allocation7 + $0xe8] sm:$0xff] }
  0x47   :  { %399 = vmatpush3.bf16.msra.mxu0 %v398_v13  ;;  %421 = vmatprep.subr.bf16.mxu1 %v420_v42  ;;  %v231_v5 = vld [vmem:[#allocation7 + $0xf8] sm:$0xff]  ;;  %v438_v6 = vpack.c.bf16 %v226_v3, %v224_v2  ;;  %v228_v8 = vld [vmem:[#allocation7 + $0xe0] sm:$0xff]  ;;  %v230_v9 = vld [vmem:[#allocation7 + $0xf0] sm:$0xff] }
  0x48   :  { %400 = vmatprep.subr.bf16.mxu0 %v560_v0  ;;  %v440_v7 = vpack.c.bf16 %v231_v5, %v229_v4  ;;  %v442_v10 = vpack.c.bf16 %v230_v9, %v228_v8  ;;  %v335_v11 = vld [vmem:[%s666_s2] ss:$0 sm:$0xff] }
  0x49   :  { %v178_v35 = vld [vmem:[%s667_s3] sm:$0x1]  ;;  %s563_s3 = smov [#allocation8]  }
  0x4a   :  { %423 = vmatpush1.bf16.msra.mxu1 %v422_v46  ;;  %v182_v39 = vld [vmem:[%s668_s4] sm:$0x1]  ;;  %s325_s4 = sshll.u32 %s563_s3, 4  ;;  %s326_s4 = int_to_ptr.vmem [resolvable:$true] %s325_s4 }
  0x4b   :  { %402 = vmatpush3.bf16.msra.mxu0 %v401_v16  ;;  %425 = vmatprep.subr.bf16.mxu1 %v424_v47  ;;  %v232_v47 = vld [vmem:[%s670_s6] sm:$0x3]  ;;  %s525_s22 = scalar_lea.vmem %s326_s4, 256  ;;  %p530_p11 = scmp.lt.s32.totalorder %s326_s4, %s326_s4 }
  0x4c   :  { %403 = vmatprep.subr.bf16.mxu0 %v560_v0  ;;  %v237_v49 = vrot.slane %v232_v47, %v188_v36  ;;  %v241_v50 = vrot.slane %v232_v47, %v240_v48  ;;  %p526_p10 = scmp.ne.s32.totalorder %s326_s4, %s525_s22  ;;  %p531_p12 = scmp.lt.s32.totalorder %s525_s22, %s525_s22 }
  0x4e   :  { %427 = vmatpush1.bf16.msra.mxu1 %v426_v52  ;;  %p532_p13 = por %p531_p12, %p530_p11 }
  0x4f   :  { %405 = vmatpush3.bf16.msra.mxu0 %v404_v19  ;;  %429 = vmatprep.subr.bf16.mxu1 %v428_v53 }
  0x50   :  { %406 = vmatprep.subr.bf16.mxu0 %v560_v0  ;;  %p533_p0 = pnand %p532_p13, %p526_p10 }
  0x52   :  { %431 = vmatpush1.bf16.msra.mxu1 %v430_v58 }
  0x53   :  { %408 = vmatpush3.bf16.msra.mxu0 %v407_v22  ;;  %433 = vmatprep.subr.bf16.mxu1 %v432_v59 }
  0x54   :  { %409 = vmatprep.subr.bf16.mxu0 %v560_v0  ;;  %v434_v0 = vpack.c.bf16 %v222_v61, %v220_v60 }
  0x56   :  { %435 = vmatpush1.bf16.msra.mxu1 %v434_v0 }
  0x57   :  { %411 = vmatpush3.bf16.msra.mxu0 %v410_v25  ;;  %437 = vmatprep.subr.bf16.mxu1 %v436_v1 }
  0x5a   :  { %386 = vmatmul.mubr.f32.vlgmr.msra.gmra.mrb[0].mxu0 %v66_v26  ;;  %439 = vmatpush1.bf16.msra.mxu1 %v438_v6 }
  0x5b   :  { %441 = vmatprep.subr.bf16.mxu1 %v440_v7 }
  0x5e   :  { %443 = vmatpush1.bf16.msra.mxu1 %v442_v10 }
 0x12d   :  { %v156_v12 = vpop.f32.mrb[0].mxu0 }
 0x12e   :  { %v157_v13 = vadd.f32 %v335_v11, %v156_v12  ;;  %v387_v14 = vpop.f32.mrb[1].mxu0 }
 0x130   :  { %v160_v15 = vrot.slane %v157_v13, 4  ;;  %v168_v16 = vmul.f32 %v157_v13, %v157_v13 }
 0x132   :  { %v161_v17 = vadd.f32 %v160_v15, %v157_v13  ;;  %v169_v18 = vrot.slane %v168_v16, 4 }
 0x134   :  { %v162_v19 = vrot.slane %v161_v17, 2  ;;  %v170_v20 = vadd.f32 %v169_v18, %v168_v16 }
 0x136   :  { %v163_v21 = vadd.f32 %v162_v19, %v161_v17  ;;  %v171_v22 = vrot.slane %v170_v20, 2 }
 0x138   :  { %v164_v23 = vrot.slane %v163_v21, 1  ;;  %v172_v24 = vadd.f32 %v171_v22, %v170_v20 }
 0x13a   :  { %v165_v25 = vadd.f32 %v164_v23, %v163_v21  ;;  %v173_v26 = vrot.slane %v172_v24, 1 }
 0x13c   :  { %v174_v27 = vadd.f32 %v173_v26, %v172_v24  ;;  %v167_v28 = vmul.f32 0.125, %v165_v25 }
 0x13e   :  { %v175_v29 = vmul.f32 0.125, %v174_v27  ;;  %v176_v30 = vmul.f32 %v167_v28, %v167_v28 }
 0x140   :  { %v177_v31 = vsub.f32 %v175_v29, %v176_v30 }
 0x142   :  { %v179_v32 = vadd.f32 0.001, %v177_v31 }
 0x144   :  { %455 = vrsqrt.f32 %v179_v32 }
 0x14e   :  { %v456_v37 = vpop.eup %455 }
 0x14f   :  { %v181_v38 = vmul.f32 %v456_v37, %v178_v35 }
 0x151   :  { %v183_v40 = vmul.f32 %v181_v38, %v167_v28  ;;  %v189_v41 = vrot.slane %v181_v38, %v188_v36 }
 0x153   :  { %v184_v42 = vsub.f32 %v182_v39, %v183_v40  ;;  %v191_v43 = vmul.f32 %v189_v41, %v157_v13 }
 0x155   :  { %v196_v44 = vrot.slane %v184_v42, %v188_v36 }
 0x157   :  { %v198_v45 = vadd.f32 %v196_v44, %v191_v43 }
 0x159   :  { %v199_v46 = vmax.f32 %v198_v45, 0.0 }
 0x15b   :  { %309 = vmatmul.mubr.f32.vlgmr.msra.gmra.mrb[0].mxu1 %v199_v46 }
 0x22e   :  { %v310_v51 = vpop.f32.mrb[0].mxu1 }
 0x22f   :  { %v311_v52 = vadd.f32 %v310_v51, %v237_v49  ;;  %v312_v53 = vpop.f32.mrb[1].mxu1 }
 0x230   :  { %v313_v54 = vadd.f32 %v312_v53, %v241_v50 }
 0x231   :  { %317 = vst [vmem:[#allocation8] sm:$0xff] %v311_v52 }
 0x232   :  { %v315_v55 = vmul.f32 1.442695, %v313_v54 }
 0x234   :  { %457 = vpow2.f32 %v315_v55 }
 0x23e   :  { %v458_v56 = vpop.eup %457 }
 0x23f   :  { %318 = vst [vmem:[#allocation8 + $0x8] sm:$0xff] %v458_v56 }
 0x240   :  { %536 = shalt.err (!%p533_p0)
}
 0x241   :  { %s537_s24 = scalar_lea.hbm %s671_s7, 256 }
 0x242   :  { %p538_p1 = scmp.ne.s32.totalorder %s671_s7, %s537_s24  ;;  %p541_p2 = scmp.lt.u32.totalorder %s537_s24, %s671_s7 }
 0x244   :  { %p543_p3 = pnand %p541_p2, %p538_p1 }
 0x246   :  { %546 = shalt.err (!%p543_p3)
}
 0x247   :  { %328 = dma.vmem_to_hbm [thread:$0]  %s326_s4, 256, %s671_s7, [#allocation4]  }
 0x248   :  { %551 = dma.done.wait [#allocation4], 256  }
 0x249   :  { %552 = vsyncadd [#allocation4], 4294967040 }
 0x24a   :  { %332 = vsyncpa [#allocation3], 1 }
 0x24b   :  { %333 = vsyncpa [#allocation6], 1 }
 0x24c   :  { %334 = vsyncpa [#allocation4], 1 }

</bundles_post_ra>
